<compile_context>
chip_gen: v7x
topology: tpu7x:2x2x1
jax: 0.10.0
libtpu: 0.0.40
codegen_flags: <defaults>
</compile_context>

<pallas_src>
import functools

import jax
import jax.numpy as jnp
from jax.experimental import pallas as pl
from jax.experimental.pallas import tpu as pltpu

EPS = 1e-5
SLOPE = 0.01  # F.leaky_relu default negative slope


def _residual_block_kernel(x_ref, w1_ref, w2_ref, s_ref,
                           g1_ref, b1_ref, g2_ref, b2_ref,
                           o_ref, pad_ref, *, count):
    N, H, WC = x_ref.shape
    M = N * H
    inv_count = 1.0 / count

    # Zero only the 1-row halo of the padded scratch (interior is overwritten).
    zero_row = jnp.zeros((N, 1, WC), jnp.float32)
    pad_ref[:, 0:1, :] = zero_row
    pad_ref[:, H + 1:H + 2, :] = zero_row

    x = x_ref[...]                                   # (N, H, WC); also the residual
    pad_ref[:, 1:H + 1, :] = x

    def conv(w_ref):
        # 3x3 "same" conv == 3 lane-dense matmuls against banded block weights.
        padv = pad_ref[...]                          # (N, H+2, WC)
        acc = jnp.dot(padv[:, 0:H, :].reshape(M, WC), w_ref[0],
                      preferred_element_type=jnp.float32)
        for ky in (1, 2):
            acc = acc + jnp.dot(padv[:, ky:ky + H, :].reshape(M, WC), w_ref[ky],
                                preferred_element_type=jnp.float32)
        return acc                                   # (M, WC) f32

    def bn(acc, g_ref, b_ref):
        # One-pass batch stats (sum & sum-of-squares); the block-identity matrix
        # S reduces over the W lane-groups and broadcasts per-channel totals
        # back to every lane.
        s1 = jnp.sum(acc, axis=0, keepdims=True)             # (1, WC)
        s2 = jnp.sum(acc * acc, axis=0, keepdims=True)       # (1, WC)
        mean = jnp.dot(s1, s_ref[...], preferred_element_type=jnp.float32) * inv_count
        ex2 = jnp.dot(s2, s_ref[...], preferred_element_type=jnp.float32) * inv_count
        var = jnp.maximum(ex2 - mean * mean, 0.0)             # biased variance
        return (acc - mean) * jax.lax.rsqrt(var + EPS) * g_ref[...] + b_ref[...]

    def lrelu(t):
        return jnp.where(t > 0, t, SLOPE * t)

    # conv1 -> bn1 -> leaky_relu
    y = lrelu(bn(conv(w1_ref), g1_ref, b1_ref))

    # Reuse the same padded scratch for conv2 (halo rows are still zero).
    pad_ref[:, 1:H + 1, :] = y.reshape(N, H, WC)

    # conv2 -> bn2 -> +residual -> leaky_relu
    z = bn(conv(w2_ref), g2_ref, b2_ref) + x.reshape(M, WC)
    o_ref[...] = lrelu(z).reshape(N, H, WC).astype(o_ref.dtype)


def _fold_conv_weight(w_oihw, w_dim):
    """(Cout, Cin, 3, 3) OIHW -> (3, W*C, W*C) banded block matrices.

    With activations folded to (N*H, W*C), the 3x3 'same' conv becomes
    acc = sum_ky pad[:, ky:ky+H, :] @ BigW[ky]; W-direction zero padding is
    implicit in the band structure (off-band entries are zero)."""
    c = w_oihw.shape[0]
    w = w_oihw.astype(jnp.float32)
    mats = []
    for ky in range(3):
        m = jnp.zeros((w_dim * c, w_dim * c), jnp.float32)
        for kx in range(3):
            # shift_eye[w_in, w_out] == 1  iff  w_in == w_out + kx - 1
            shift_eye = jnp.eye(w_dim, k=1 - kx, dtype=jnp.float32)
            m = m + jnp.kron(shift_eye, w[:, :, ky, kx].T)
        mats.append(m)
    return jnp.stack(mats)                           # (3, W*C, W*C)


def residual_block_forward(x_nchw, params):
    """params = (w1, g1, b1, w2, g2, b2) with PyTorch shapes:
       w: (C, C, 3, 3) [OIHW], g/b: (C,). Input/output are NCHW."""
    w1, g1, b1, w2, g2, b2 = params
    N, C, H, W = x_nchw.shape
    WC = W * C

    # NCHW -> NHWC -> fold (W, C) into one lane-dense trailing dim (glue only).
    x = jnp.transpose(x_nchw, (0, 2, 3, 1)).astype(jnp.float32).reshape(N, H, WC)

    w1_big = _fold_conv_weight(w1, W)                # (3, WC, WC)
    w2_big = _fold_conv_weight(w2, W)
    # Block-identity: reduces over W lane-groups / broadcasts channel stats.
    s_mat = jnp.kron(jnp.ones((W, W), jnp.float32), jnp.eye(C, dtype=jnp.float32))
    g1_l = jnp.tile(g1.astype(jnp.float32), W).reshape(1, WC)
    b1_l = jnp.tile(b1.astype(jnp.float32), W).reshape(1, WC)
    g2_l = jnp.tile(g2.astype(jnp.float32), W).reshape(1, WC)
    b2_l = jnp.tile(b2.astype(jnp.float32), W).reshape(1, WC)

    kernel = functools.partial(_residual_block_kernel, count=float(N * H * W))

    out = pl.pallas_call(
        kernel,
        out_shape=jax.ShapeDtypeStruct((N, H, WC), jnp.float32),
        in_specs=[pl.BlockSpec(memory_space=pltpu.MemorySpace.VMEM)] * 8,
        out_specs=pl.BlockSpec(memory_space=pltpu.MemorySpace.VMEM),
        scratch_shapes=[pltpu.VMEM((N, H + 2, WC), jnp.float32)],
        compiler_params=pltpu.CompilerParams(vmem_limit_bytes=32 * 1024 * 1024),
    )(x, w1_big, w2_big, s_mat, g1_l, b1_l, g2_l, b2_l)

    # (N, H, W*C) -> NCHW
    return jnp.transpose(out.reshape(N, H, W, C), (0, 3, 1, 2))


def residual_block_reference(x_nchw, params):
    """Pure-JAX reference mirroring the PyTorch module (training-mode BN)."""
    w1, g1, b1, w2, g2, b2 = params

    def conv(x, w):
        return jax.lax.conv_general_dilated(
            x, w, window_strides=(1, 1), padding=((1, 1), (1, 1)),
            dimension_numbers=("NCHW", "OIHW", "NCHW"))

    def bn(x, g, b):
        mean = x.mean(axis=(0, 2, 3), keepdims=True)
        var = ((x - mean) ** 2).mean(axis=(0, 2, 3), keepdims=True)
        return ((x - mean) * jax.lax.rsqrt(var + EPS)
                * g.reshape(1, -1, 1, 1) + b.reshape(1, -1, 1, 1))

    def lrelu(x):
        return jnp.where(x > 0, x, SLOPE * x)

    out = lrelu(bn(conv(x_nchw, w1), g1, b1))
    out = bn(conv(out, w2), g2, b2) + x_nchw
    return lrelu(out)


if __name__ == "__main__":
    N, C, H, W = 2, 8, 16, 16            # W*C = 128 -> exactly one lane-dense row
    key = jax.random.PRNGKey(0)
    kx_, k1, k2, kg1, kb1, kg2, kb2 = jax.random.split(key, 7)

    x = jax.random.normal(kx_, (N, C, H, W), jnp.float32)
    w1 = 0.1 * jax.random.normal(k1, (C, C, 3, 3), jnp.float32)   # conv1 weight (OIHW)
    w2 = 0.1 * jax.random.normal(k2, (C, C, 3, 3), jnp.float32)   # conv2 weight (OIHW)
    g1 = 1.0 + 0.1 * jax.random.normal(kg1, (C,), jnp.float32)    # bn1 gamma
    b1 = 0.1 * jax.random.normal(kb1, (C,), jnp.float32)          # bn1 beta
    g2 = 1.0 + 0.1 * jax.random.normal(kg2, (C,), jnp.float32)    # bn2 gamma
    b2 = 0.1 * jax.random.normal(kb2, (C,), jnp.float32)          # bn2 beta
    params = (w1, g1, b1, w2, g2, b2)

    out = jax.block_until_ready(residual_block_forward(x, params))
    ref = jax.block_until_ready(residual_block_reference(x, params))

    assert out.shape == (N, C, H, W)
    assert jnp.allclose(out, ref, rtol=1e-3, atol=1e-3), \
        f"max abs err {jnp.max(jnp.abs(out - ref))}"

    print("KERNEL_OK")
</pallas_src>

<mosaic_0001>
module attributes {stable_mosaic.version = 11 : i64} {
  func.func @_residual_block_kernel(%arg0: memref<2x16x128xf32, #tpu.memory_space<vmem>>, %arg1: memref<3x128x128xf32, #tpu.memory_space<vmem>>, %arg2: memref<3x128x128xf32, #tpu.memory_space<vmem>>, %arg3: memref<128x128xf32, #tpu.memory_space<vmem>>, %arg4: memref<1x128xf32, #tpu.memory_space<vmem>>, %arg5: memref<1x128xf32, #tpu.memory_space<vmem>>, %arg6: memref<1x128xf32, #tpu.memory_space<vmem>>, %arg7: memref<1x128xf32, #tpu.memory_space<vmem>>, %arg8: memref<2x16x128xf32, #tpu.memory_space<vmem>>, %arg9: memref<2x18x128xf32, #tpu.memory_space<vmem>>) attributes {dimension_semantics = [], scalar_prefetch = 0 : i64, scratch_operands = 1 : i64, tpu.core_type = #tpu.core_type<tc>} {
    %cst = arith.constant 0.000000e+00 : f32
    %0 = vector.broadcast %cst : f32 to vector<2x1x128xf32>
    %c0 = arith.constant 0 : index
    %c0_0 = arith.constant 0 : index
    %c0_1 = arith.constant 0 : index
    %1 = vector.load %arg9[%c0, %c0_0, %c0_1] : memref<2x18x128xf32, #tpu.memory_space<vmem>>, vector<2x1x128xf32>
    tpu.vector_store %arg9[%c0, %c0_0, %c0_1], %0 {strides = array<i32>} : memref<2x18x128xf32, #tpu.memory_space<vmem>>, vector<2x1x128xf32>,
    %c0_2 = arith.constant 0 : index
    %c17 = arith.constant 17 : index
    %c0_3 = arith.constant 0 : index
    %2 = vector.load %arg9[%c0_2, %c17, %c0_3] : memref<2x18x128xf32, #tpu.memory_space<vmem>>, vector<2x1x128xf32>
    tpu.vector_store %arg9[%c0_2, %c17, %c0_3], %0 {strides = array<i32>} : memref<2x18x128xf32, #tpu.memory_space<vmem>>, vector<2x1x128xf32>,
    %c0_4 = arith.constant 0 : index
    %c0_5 = arith.constant 0 : index
    %c0_6 = arith.constant 0 : index
    %3 = vector.load %arg0[%c0_4, %c0_5, %c0_6] : memref<2x16x128xf32, #tpu.memory_space<vmem>>, vector<2x16x128xf32>
    %c0_7 = arith.constant 0 : index
    %c1 = arith.constant 1 : index
    %c0_8 = arith.constant 0 : index
    %4 = vector.load %arg9[%c0_7, %c1, %c0_8] : memref<2x18x128xf32, #tpu.memory_space<vmem>>, vector<2x16x128xf32>
    tpu.vector_store %arg9[%c0_7, %c1, %c0_8], %3 {strides = array<i32>} : memref<2x18x128xf32, #tpu.memory_space<vmem>>, vector<2x16x128xf32>,
    %c0_9 = arith.constant 0 : index
    %c0_10 = arith.constant 0 : index
    %c0_11 = arith.constant 0 : index
    %5 = vector.load %arg9[%c0_9, %c0_10, %c0_11] : memref<2x18x128xf32, #tpu.memory_space<vmem>>, vector<2x18x128xf32>
    %6 = vector.extract_strided_slice %5 {offsets = [0, 0, 0], sizes = [2, 16, 128], strides = [1, 1, 1]} : vector<2x18x128xf32> to vector<2x16x128xf32>
    %7 = vector.shape_cast %6 : vector<2x16x128xf32> to vector<32x128xf32>
    %c0_12 = arith.constant 0 : index
    %c0_13 = arith.constant 0 : index
    %c0_14 = arith.constant 0 : index
    %8 = vector.load %arg1[%c0_12, %c0_13, %c0_14] : memref<3x128x128xf32, #tpu.memory_space<vmem>>, vector<1x128x128xf32>
    %9 = vector.shape_cast %8 : vector<1x128x128xf32> to vector<128x128xf32>
    %cst_15 = arith.constant dense<0.000000e+00> : vector<32x128xf32>
    %10 = tpu.matmul %7, %9, %cst_15 {dimension_numbers = #tpu.dot_dimension_numbers<[1], [0], [0], [1], [0, 0, 1, 1], [], []>} : vector<32x128xf32>, vector<128x128xf32>, vector<32x128xf32> -> vector<32x128xf32>
    %11 = vector.extract_strided_slice %5 {offsets = [0, 1, 0], sizes = [2, 16, 128], strides = [1, 1, 1]} : vector<2x18x128xf32> to vector<2x16x128xf32>
    %12 = vector.shape_cast %11 : vector<2x16x128xf32> to vector<32x128xf32>
    %c1_16 = arith.constant 1 : index
    %c0_17 = arith.constant 0 : index
    %c0_18 = arith.constant 0 : index
    %13 = vector.load %arg1[%c1_16, %c0_17, %c0_18] : memref<3x128x128xf32, #tpu.memory_space<vmem>>, vector<1x128x128xf32>
    %14 = vector.shape_cast %13 : vector<1x128x128xf32> to vector<128x128xf32>
    %cst_19 = arith.constant dense<0.000000e+00> : vector<32x128xf32>
    %15 = tpu.matmul %12, %14, %cst_19 {dimension_numbers = #tpu.dot_dimension_numbers<[1], [0], [0], [1], [0, 0, 1, 1], [], []>} : vector<32x128xf32>, vector<128x128xf32>, vector<32x128xf32> -> vector<32x128xf32>
    %16 = arith.addf %10, %15 : vector<32x128xf32>
    %17 = vector.extract_strided_slice %5 {offsets = [0, 2, 0], sizes = [2, 16, 128], strides = [1, 1, 1]} : vector<2x18x128xf32> to vector<2x16x128xf32>
    %18 = vector.shape_cast %17 : vector<2x16x128xf32> to vector<32x128xf32>
    %c2 = arith.constant 2 : index
    %c0_20 = arith.constant 0 : index
    %c0_21 = arith.constant 0 : index
    %19 = vector.load %arg1[%c2, %c0_20, %c0_21] : memref<3x128x128xf32, #tpu.memory_space<vmem>>, vector<1x128x128xf32>
    %20 = vector.shape_cast %19 : vector<1x128x128xf32> to vector<128x128xf32>
    %cst_22 = arith.constant dense<0.000000e+00> : vector<32x128xf32>
    %21 = tpu.matmul %18, %20, %cst_22 {dimension_numbers = #tpu.dot_dimension_numbers<[1], [0], [0], [1], [0, 0, 1, 1], [], []>} : vector<32x128xf32>, vector<128x128xf32>, vector<32x128xf32> -> vector<32x128xf32>
    %22 = arith.addf %16, %21 : vector<32x128xf32>
    %cst_23 = arith.constant dense<0.000000e+00> : vector<128xf32>
    %23 = vector.multi_reduction <add>, %22, %cst_23 [0] : vector<32x128xf32> to vector<128xf32>
    %24 = vector.shape_cast %23 : vector<128xf32> to vector<1x128xf32>
    %25 = arith.mulf %22, %22 : vector<32x128xf32>
    %cst_24 = arith.constant dense<0.000000e+00> : vector<128xf32>
    %26 = vector.multi_reduction <add>, %25, %cst_24 [0] : vector<32x128xf32> to vector<128xf32>
    %27 = vector.shape_cast %26 : vector<128xf32> to vector<1x128xf32>
    %c0_25 = arith.constant 0 : index
    %c0_26 = arith.constant 0 : index
    %28 = vector.load %arg3[%c0_25, %c0_26] : memref<128x128xf32, #tpu.memory_space<vmem>>, vector<128x128xf32>
    %cst_27 = arith.constant dense<0.000000e+00> : vector<1x128xf32>
    %29 = tpu.matmul %24, %28, %cst_27 {dimension_numbers = #tpu.dot_dimension_numbers<[1], [0], [0], [1], [0, 0, 1, 1], [], []>} : vector<1x128xf32>, vector<128x128xf32>, vector<1x128xf32> -> vector<1x128xf32>
    %cst_28 = arith.constant 0.001953125 : f32
    %30 = vector.broadcast %cst_28 : f32 to vector<1x128xf32>
    %31 = arith.mulf %29, %30 : vector<1x128xf32>
    %c0_29 = arith.constant 0 : index
    %c0_30 = arith.constant 0 : index
    %32 = vector.load %arg3[%c0_29, %c0_30] : memref<128x128xf32, #tpu.memory_space<vmem>>, vector<128x128xf32>
    %cst_31 = arith.constant dense<0.000000e+00> : vector<1x128xf32>
    %33 = tpu.matmul %27, %32, %cst_31 {dimension_numbers = #tpu.dot_dimension_numbers<[1], [0], [0], [1], [0, 0, 1, 1], [], []>} : vector<1x128xf32>, vector<128x128xf32>, vector<1x128xf32> -> vector<1x128xf32>
    %cst_32 = arith.constant 0.001953125 : f32
    %34 = vector.broadcast %cst_32 : f32 to vector<1x128xf32>
    %35 = arith.mulf %33, %34 : vector<1x128xf32>
    %36 = arith.mulf %31, %31 : vector<1x128xf32>
    %37 = arith.subf %35, %36 : vector<1x128xf32>
    %cst_33 = arith.constant 0.000000e+00 : f32
    %38 = vector.broadcast %cst_33 : f32 to vector<1x128xf32>
    %39 = arith.maximumf %37, %38 : vector<1x128xf32>
    %40 = vector.broadcast %31 : vector<1x128xf32> to vector<32x128xf32>
    %41 = arith.subf %22, %40 : vector<32x128xf32>
    %cst_34 = arith.constant 9.99999974E-6 : f32
    %42 = vector.broadcast %cst_34 : f32 to vector<1x128xf32>
    %43 = arith.addf %39, %42 : vector<1x128xf32>
    %44 = math.rsqrt %43 : vector<1x128xf32>
    %45 = vector.broadcast %44 : vector<1x128xf32> to vector<32x128xf32>
    %46 = arith.mulf %41, %45 : vector<32x128xf32>
    %c0_35 = arith.constant 0 : index
    %c0_36 = arith.constant 0 : index
    %47 = vector.load %arg4[%c0_35, %c0_36] : memref<1x128xf32, #tpu.memory_space<vmem>>, vector<1x128xf32>
    %48 = vector.broadcast %47 : vector<1x128xf32> to vector<32x128xf32>
    %49 = arith.mulf %46, %48 : vector<32x128xf32>
    %c0_37 = arith.constant 0 : index
    %c0_38 = arith.constant 0 : index
    %50 = vector.load %arg5[%c0_37, %c0_38] : memref<1x128xf32, #tpu.memory_space<vmem>>, vector<1x128xf32>
    %51 = vector.broadcast %50 : vector<1x128xf32> to vector<32x128xf32>
    %52 = arith.addf %49, %51 : vector<32x128xf32>
    %cst_39 = arith.constant 0.000000e+00 : f32
    %53 = vector.broadcast %cst_39 : f32 to vector<32x128xf32>
    %54 = arith.cmpf ogt, %52, %53 : vector<32x128xf32>
    %cst_40 = arith.constant 0.00999999977 : f32
    %55 = vector.broadcast %cst_40 : f32 to vector<32x128xf32>
    %56 = arith.mulf %55, %52 : vector<32x128xf32>
    %57 = arith.select %54, %52, %56 : vector<32x128xi1>, vector<32x128xf32>
    %58 = vector.shape_cast %57 : vector<32x128xf32> to vector<2x16x128xf32>
    %c0_41 = arith.constant 0 : index
    %c1_42 = arith.constant 1 : index
    %c0_43 = arith.constant 0 : index
    %59 = vector.load %arg9[%c0_41, %c1_42, %c0_43] : memref<2x18x128xf32, #tpu.memory_space<vmem>>, vector<2x16x128xf32>
    tpu.vector_store %arg9[%c0_41, %c1_42, %c0_43], %58 {strides = array<i32>} : memref<2x18x128xf32, #tpu.memory_space<vmem>>, vector<2x16x128xf32>,
    %c0_44 = arith.constant 0 : index
    %c0_45 = arith.constant 0 : index
    %c0_46 = arith.constant 0 : index
    %60 = vector.load %arg9[%c0_44, %c0_45, %c0_46] : memref<2x18x128xf32, #tpu.memory_space<vmem>>, vector<2x18x128xf32>
    %61 = vector.extract_strided_slice %60 {offsets = [0, 0, 0], sizes = [2, 16, 128], strides = [1, 1, 1]} : vector<2x18x128xf32> to vector<2x16x128xf32>
    %62 = vector.shape_cast %61 : vector<2x16x128xf32> to vector<32x128xf32>
    %c0_47 = arith.constant 0 : index
    %c0_48 = arith.constant 0 : index
    %c0_49 = arith.constant 0 : index
    %63 = vector.load %arg2[%c0_47, %c0_48, %c0_49] : memref<3x128x128xf32, #tpu.memory_space<vmem>>, vector<1x128x128xf32>
    %64 = vector.shape_cast %63 : vector<1x128x128xf32> to vector<128x128xf32>
    %cst_50 = arith.constant dense<0.000000e+00> : vector<32x128xf32>
    %65 = tpu.matmul %62, %64, %cst_50 {dimension_numbers = #tpu.dot_dimension_numbers<[1], [0], [0], [1], [0, 0, 1, 1], [], []>} : vector<32x128xf32>, vector<128x128xf32>, vector<32x128xf32> -> vector<32x128xf32>
    %66 = vector.extract_strided_slice %60 {offsets = [0, 1, 0], sizes = [2, 16, 128], strides = [1, 1, 1]} : vector<2x18x128xf32> to vector<2x16x128xf32>
    %67 = vector.shape_cast %66 : vector<2x16x128xf32> to vector<32x128xf32>
    %c1_51 = arith.constant 1 : index
    %c0_52 = arith.constant 0 : index
    %c0_53 = arith.constant 0 : index
    %68 = vector.load %arg2[%c1_51, %c0_52, %c0_53] : memref<3x128x128xf32, #tpu.memory_space<vmem>>, vector<1x128x128xf32>
    %69 = vector.shape_cast %68 : vector<1x128x128xf32> to vector<128x128xf32>
    %cst_54 = arith.constant dense<0.000000e+00> : vector<32x128xf32>
    %70 = tpu.matmul %67, %69, %cst_54 {dimension_numbers = #tpu.dot_dimension_numbers<[1], [0], [0], [1], [0, 0, 1, 1], [], []>} : vector<32x128xf32>, vector<128x128xf32>, vector<32x128xf32> -> vector<32x128xf32>
    %71 = arith.addf %65, %70 : vector<32x128xf32>
    %72 = vector.extract_strided_slice %60 {offsets = [0, 2, 0], sizes = [2, 16, 128], strides = [1, 1, 1]} : vector<2x18x128xf32> to vector<2x16x128xf32>
    %73 = vector.shape_cast %72 : vector<2x16x128xf32> to vector<32x128xf32>
    %c2_55 = arith.constant 2 : index
    %c0_56 = arith.constant 0 : index
    %c0_57 = arith.constant 0 : index
    %74 = vector.load %arg2[%c2_55, %c0_56, %c0_57] : memref<3x128x128xf32, #tpu.memory_space<vmem>>, vector<1x128x128xf32>
    %75 = vector.shape_cast %74 : vector<1x128x128xf32> to vector<128x128xf32>
    %cst_58 = arith.constant dense<0.000000e+00> : vector<32x128xf32>
    %76 = tpu.matmul %73, %75, %cst_58 {dimension_numbers = #tpu.dot_dimension_numbers<[1], [0], [0], [1], [0, 0, 1, 1], [], []>} : vector<32x128xf32>, vector<128x128xf32>, vector<32x128xf32> -> vector<32x128xf32>
    %77 = arith.addf %71, %76 : vector<32x128xf32>
    %cst_59 = arith.constant dense<0.000000e+00> : vector<128xf32>
    %78 = vector.multi_reduction <add>, %77, %cst_59 [0] : vector<32x128xf32> to vector<128xf32>
    %79 = vector.shape_cast %78 : vector<128xf32> to vector<1x128xf32>
    %80 = arith.mulf %77, %77 : vector<32x128xf32>
    %cst_60 = arith.constant dense<0.000000e+00> : vector<128xf32>
    %81 = vector.multi_reduction <add>, %80, %cst_60 [0] : vector<32x128xf32> to vector<128xf32>
    %82 = vector.shape_cast %81 : vector<128xf32> to vector<1x128xf32>
    %c0_61 = arith.constant 0 : index
    %c0_62 = arith.constant 0 : index
    %83 = vector.load %arg3[%c0_61, %c0_62] : memref<128x128xf32, #tpu.memory_space<vmem>>, vector<128x128xf32>
    %cst_63 = arith.constant dense<0.000000e+00> : vector<1x128xf32>
    %84 = tpu.matmul %79, %83, %cst_63 {dimension_numbers = #tpu.dot_dimension_numbers<[1], [0], [0], [1], [0, 0, 1, 1], [], []>} : vector<1x128xf32>, vector<128x128xf32>, vector<1x128xf32> -> vector<1x128xf32>
    %cst_64 = arith.constant 0.001953125 : f32
    %85 = vector.broadcast %cst_64 : f32 to vector<1x128xf32>
    %86 = arith.mulf %84, %85 : vector<1x128xf32>
    %c0_65 = arith.constant 0 : index
    %c0_66 = arith.constant 0 : index
    %87 = vector.load %arg3[%c0_65, %c0_66] : memref<128x128xf32, #tpu.memory_space<vmem>>, vector<128x128xf32>
    %cst_67 = arith.constant dense<0.000000e+00> : vector<1x128xf32>
    %88 = tpu.matmul %82, %87, %cst_67 {dimension_numbers = #tpu.dot_dimension_numbers<[1], [0], [0], [1], [0, 0, 1, 1], [], []>} : vector<1x128xf32>, vector<128x128xf32>, vector<1x128xf32> -> vector<1x128xf32>
    %cst_68 = arith.constant 0.001953125 : f32
    %89 = vector.broadcast %cst_68 : f32 to vector<1x128xf32>
    %90 = arith.mulf %88, %89 : vector<1x128xf32>
    %91 = arith.mulf %86, %86 : vector<1x128xf32>
    %92 = arith.subf %90, %91 : vector<1x128xf32>
    %cst_69 = arith.constant 0.000000e+00 : f32
    %93 = vector.broadcast %cst_69 : f32 to vector<1x128xf32>
    %94 = arith.maximumf %92, %93 : vector<1x128xf32>
    %95 = vector.broadcast %86 : vector<1x128xf32> to vector<32x128xf32>
    %96 = arith.subf %77, %95 : vector<32x128xf32>
    %cst_70 = arith.constant 9.99999974E-6 : f32
    %97 = vector.broadcast %cst_70 : f32 to vector<1x128xf32>
    %98 = arith.addf %94, %97 : vector<1x128xf32>
    %99 = math.rsqrt %98 : vector<1x128xf32>
    %100 = vector.broadcast %99 : vector<1x128xf32> to vector<32x128xf32>
    %101 = arith.mulf %96, %100 : vector<32x128xf32>
    %c0_71 = arith.constant 0 : index
    %c0_72 = arith.constant 0 : index
    %102 = vector.load %arg6[%c0_71, %c0_72] : memref<1x128xf32, #tpu.memory_space<vmem>>, vector<1x128xf32>
    %103 = vector.broadcast %102 : vector<1x128xf32> to vector<32x128xf32>
    %104 = arith.mulf %101, %103 : vector<32x128xf32>
    %c0_73 = arith.constant 0 : index
    %c0_74 = arith.constant 0 : index
    %105 = vector.load %arg7[%c0_73, %c0_74] : memref<1x128xf32, #tpu.memory_space<vmem>>, vector<1x128xf32>
    %106 = vector.broadcast %105 : vector<1x128xf32> to vector<32x128xf32>
    %107 = arith.addf %104, %106 : vector<32x128xf32>
    %108 = vector.shape_cast %3 : vector<2x16x128xf32> to vector<32x128xf32>
    %109 = arith.addf %107, %108 : vector<32x128xf32>
    %cst_75 = arith.constant 0.000000e+00 : f32
    %110 = vector.broadcast %cst_75 : f32 to vector<32x128xf32>
    %111 = arith.cmpf ogt, %109, %110 : vector<32x128xf32>
    %cst_76 = arith.constant 0.00999999977 : f32
    %112 = vector.broadcast %cst_76 : f32 to vector<32x128xf32>
    %113 = arith.mulf %112, %109 : vector<32x128xf32>
    %114 = arith.select %111, %109, %113 : vector<32x128xi1>, vector<32x128xf32>
    %115 = vector.shape_cast %114 : vector<32x128xf32> to vector<2x16x128xf32>
    %c0_77 = arith.constant 0 : index
    %c0_78 = arith.constant 0 : index
    %c0_79 = arith.constant 0 : index
    %116 = vector.load %arg8[%c0_77, %c0_78, %c0_79] : memref<2x16x128xf32, #tpu.memory_space<vmem>>, vector<2x16x128xf32>
    tpu.vector_store %arg8[%c0_77, %c0_78, %c0_79], %115 {strides = array<i32>} : memref<2x16x128xf32, #tpu.memory_space<vmem>>, vector<2x16x128xf32>,
    return
  }
}

</mosaic_0001>

<bundles_post_ra>
// kernel: tpu_custom_call.1
= control target key start
LH: loop header
LB: loop body
LE: loop exit
PB: predicated region body
PF: predicated region fallthrough
CT: control target
= control target key end

     0   :  { %13 = vsyncpa [#allocation4], 0  ;;  %s2672_s0 = inlined_call_operand.hbm [shape: f32[2,16,128], index: 0, kind: input, shape index: {}]   ;;  %s2673_s1 = inlined_call_operand.hbm [shape: f32[3,128,128], index: 1, kind: input, shape index: {}]   ;;  %s2674_s2 = inlined_call_operand.hbm [shape: f32[3,128,128], index: 2, kind: input, shape index: {}]   ;;  %s2675_s3 = inlined_call_operand.hbm [shape: f32[128,128], index: 3, kind: input, shape index: {}]   ;;  %s2676_s4 = inlined_call_operand.vmem [shape: f32[1,128], index: 4, kind: input, shape index: {}]   ;;  %s2677_s5 = inlined_call_operand.vmem [shape: f32[1,128], index: 5, kind: input, shape index: {}]   ;;  %s2678_s6 = inlined_call_operand.vmem [shape: f32[1,128], index: 6, kind: input, shape index: {}]   ;;  %s2679_s7 = inlined_call_operand.vmem [shape: f32[1,128], index: 7, kind: input, shape index: {}]   ;;  %s2680_s8 = inlined_call_operand.hbm [shape: f32[2,16,128], index: 8, kind: output, shape index: {}]  }
   0x1   :  { %14 = vsyncpa [#allocation7], 0 }
   0x2   :  { %15 = vsyncpa [#allocation10], 0 }
   0x3   :  { %16 = vsyncpa [#allocation5], 0  ;;  %s2294_s27 = smov [#allocation6]   ;;  %s2295_s29 = smov [#allocation3]  }
   0x4   :  { %s34_s28 = sshll.u32 %s2294_s27, 4  ;;  %s22_s30 = sshll.u32 %s2295_s29, 4  ;;  %s35_s28 = int_to_ptr.vmem [resolvable:$true] %s34_s28  ;;  %s2349_s30 = int_to_ptr.vmem [resolvable:$true] %s22_s30 }
   0x5   :  { %s2176_s11 = scalar_lea.hbm %s2673_s1, 6144 }
   0x6   :  { %p2177_p0 = scmp.ne.s32.totalorder %s2673_s1, %s2176_s11  ;;  %p2180_p1 = scmp.lt.u32.totalorder %s2176_s11, %s2673_s1 }
   0x8   :  { %p2182_p2 = pnand %p2180_p1, %p2177_p0 }
   0xa   :  { %2185 = shalt.err (!%p2182_p2)
}
   0xb   :  { %s2186_s16 = scalar_lea.vmem %s35_s28, 6144  ;;  %p2191_p4 = scmp.lt.s32.totalorder %s35_s28, %s35_s28 }
   0xc   :  { %p2187_p3 = scmp.ne.s32.totalorder %s35_s28, %s2186_s16  ;;  %p2192_p5 = scmp.lt.s32.totalorder %s2186_s16, %s2186_s16 }
   0xe   :  { %p2193_p6 = por %p2192_p5, %p2191_p4 }
  0x10   :  { %p2194_p7 = pnand %p2193_p6, %p2187_p3 }
  0x12   :  { %2197 = shalt.err (!%p2194_p7)
}
  0x13   :  { %s2296_s17 = smov 128   ;;  %s2297_s18 = smov 8  }
  0x14   :  { %40 = dma.hbm_to_vmem [thread:$0]  %s2673_s1, 6144, %s35_s28, [#allocation7], %s2296_s17, %s2296_s17, %s2297_s18  }
  0x15   :  { %s2198_s23 = scalar_lea.hbm %s2672_s0, 512 }
  0x16   :  { %p2199_p8 = scmp.ne.s32.totalorder %s2672_s0, %s2198_s23  ;;  %p2202_p9 = scmp.lt.u32.totalorder %s2198_s23, %s2672_s0 }
  0x18   :  { %p2204_p10 = pnand %p2202_p9, %p2199_p8 }
  0x1a   :  { %2207 = shalt.err (!%p2204_p10)
}
  0x1b   :  { %s2208_s29 = scalar_lea.vmem %s2349_s30, 512  ;;  %p2213_p12 = scmp.lt.s32.totalorder %s2349_s30, %s2349_s30 }
  0x1c   :  { %p2209_p11 = scmp.ne.s32.totalorder %s2349_s30, %s2208_s29  ;;  %p2214_p13 = scmp.lt.s32.totalorder %s2208_s29, %s2208_s29 }
  0x1e   :  { %p2215_p0 = por %p2214_p13, %p2213_p12 }
  0x20   :  { %p2216_p1 = pnand %p2215_p0, %p2209_p11 }
  0x22   :  { %2219 = shalt.err (!%p2216_p1)
}
  0x23   :  { %28 = dma.hbm_to_vmem [thread:$0]  %s2672_s0, 512, %s2349_s30, [#allocation4], %s2296_s17, %s2296_s17, %s2297_s18  }
  0x24   :  { %s2298_s9 = smov [#allocation8]   ;;  %s2299_s11 = smov [#allocation9]  }
  0x25   :  { %s46_s10 = sshll.u32 %s2298_s9, 4  ;;  %s58_s12 = sshll.u32 %s2299_s11, 4  ;;  %s47_s10 = int_to_ptr.vmem [resolvable:$true] %s46_s10  ;;  %s2386_s12 = int_to_ptr.vmem [resolvable:$true] %s58_s12 }
  0x26   :  { %s2220_s15 = scalar_lea.hbm %s2674_s2, 6144 }
  0x27   :  { %p2221_p2 = scmp.ne.s32.totalorder %s2674_s2, %s2220_s15  ;;  %p2224_p3 = scmp.lt.u32.totalorder %s2220_s15, %s2674_s2 }
  0x29   :  { %p2226_p4 = pnand %p2224_p3, %p2221_p2 }
  0x2b   :  { %2229 = shalt.err (!%p2226_p4)
}
  0x2c   :  { %s2230_s0 = scalar_lea.vmem %s47_s10, 6144  ;;  %p2235_p6 = scmp.lt.s32.totalorder %s47_s10, %s47_s10 }
  0x2d   :  { %p2231_p5 = scmp.ne.s32.totalorder %s47_s10, %s2230_s0  ;;  %p2236_p7 = scmp.lt.s32.totalorder %s2230_s0, %s2230_s0 }
  0x2f   :  { %p2237_p8 = por %p2236_p7, %p2235_p6 }
  0x31   :  { %p2238_p9 = pnand %p2237_p8, %p2231_p5 }
  0x33   :  { %2241 = shalt.err (!%p2238_p9)
}
  0x34   :  { %52 = dma.hbm_to_vmem [thread:$0]  %s2674_s2, 6144, %s47_s10, [#allocation7], %s2296_s17, %s2296_s17, %s2297_s18  }
  0x35   :  { %s2242_s25 = scalar_lea.hbm %s2675_s3, 2048 }
  0x36   :  { %p2243_p10 = scmp.ne.s32.totalorder %s2675_s3, %s2242_s25  ;;  %p2246_p11 = scmp.lt.u32.totalorder %s2242_s25, %s2675_s3 }
  0x38   :  { %p2248_p12 = pnand %p2246_p11, %p2243_p10 }
  0x3a   :  { %2251 = shalt.err (!%p2248_p12)
}
  0x3b   :  { %s2252_s28 = scalar_lea.vmem %s2386_s12, 2048  ;;  %p2257_p0 = scmp.lt.s32.totalorder %s2386_s12, %s2386_s12 }
  0x3c   :  { %p2253_p13 = scmp.ne.s32.totalorder %s2386_s12, %s2252_s28  ;;  %p2258_p1 = scmp.lt.s32.totalorder %s2252_s28, %s2252_s28 }
  0x3e   :  { %p2259_p2 = por %p2258_p1, %p2257_p0 }
  0x40   :  { %p2260_p3 = pnand %p2259_p2, %p2253_p13 }
  0x42   :  { %2263 = shalt.err (!%p2260_p3)
}
  0x43   :  { %64 = dma.hbm_to_vmem [thread:$0]  %s2675_s3, 2048, %s2386_s12, [#allocation10], %s2296_s17, %s2296_s17, %s2297_s18  }
  0x44   :  { %2286 = dma.done.wait [#allocation4], 512  }
  0x45   :  { %2287 = vsyncadd [#allocation4], 4294966784 }
  0x46   :  { %2288 = dma.done.wait [#allocation7], 12288  }
  0x47   :  { %2289 = vsyncadd [#allocation7], 4294955008 }
  0x48   :  { %2290 = dma.done.wait [#allocation10], 2048  }
  0x49   :  { %2291 = vsyncadd [#allocation10], 4294965248  ;;  %v2300_v0 = vmov 0.0   ;;  %v2301_v1 = vmov 0.0|0.0   ;;  %v141_v2 = vld [vmem:[#allocation6 + $0x80] sm:$0xff]  ;;  %v142_v3 = vld [vmem:[#allocation6 + $0x88] sm:$0xff] }
  0x4a   :  { %85 = vst [vmem:[#allocation2] sm:$0x1] %v2300_v0  ;;  %86 = vst [vmem:[#allocation2 + $0x18] sm:$0x1] %v2300_v0  ;;  %1954 = vmatprep.subr.bf16.mxu1 %v2301_v1  ;;  %v143_v4 = vld [vmem:[#allocation6 + $0x90] sm:$0xff]  ;;  %v1858_v5 = vpack.c.bf16 %v142_v3, %v141_v2  ;;  %v144_v6 = vld [vmem:[#allocation6 + $0x98] sm:$0xff] }
  0x4b   :  { %87 = vst [vmem:[#allocation2 + $0x11] sm:$0x1] %v2300_v0  ;;  %88 = vst [vmem:[#allocation2 + $0x29] sm:$0x1] %v2300_v0  ;;  %v1862_v7 = vpack.c.bf16 %v144_v6, %v143_v4  ;;  %v145_v8 = vld [vmem:[#allocation6 + $0xa0] sm:$0xff]  ;;  %v146_v9 = vld [vmem:[#allocation6 + $0xa8] sm:$0xff] }
  0x4c   :  { %1859 = vmatprep.subr.bf16.mxu0 %v1858_v5  ;;  %v1866_v10 = vpack.c.bf16 %v146_v9, %v145_v8  ;;  %v2428_v11 = vld [vmem:[#allocation3] sm:$0xff]  ;;  %v2430_v12 = vld [vmem:[#allocation3 + $0x8] sm:$0xff]  ;;  %v147_v13 = vld [vmem:[#allocation6 + $0xb0] sm:$0xff]  ;;  %vm125_vm0 = vcmask 1046528   ;;  %vm327_vm1 = vcmask 1045504   ;;  %vm2302_vm2 = vmmov 0  }
  0x4d   :  { %1861 = vmatpush3.bf16.msra.mxu0 %v1858_v5  ;;  %v148_v14 = vld [vmem:[#allocation6 + $0xb8] sm:$0xff]  ;;  %93 = vst [vmem:[#allocation2 + $0x1] sm:$0xff] %v2428_v11  ;;  %94 = vst [vmem:[#allocation2 + $0x9] sm:$0xff] %v2430_v12  ;;  %v149_v16 = vld [vmem:[#allocation6 + $0xc0] sm:$0xff]  ;;  %1636 = vmatprep.mubr.msk.f32.mxu1 %vm2302_vm2, %v2300_v0 }
  0x4e   :  { %1863 = vmatprep.subr.bf16.mxu0 %v1862_v7  ;;  %v1870_v15 = vpack.c.bf16 %v148_v14, %v147_v13  ;;  %v150_v17 = vld [vmem:[#allocation6 + $0xc8] sm:$0xff]  ;;  %v2434_v18 = vld [vmem:[#allocation3 + $0x10] sm:$0xff]  ;;  %v2436_v19 = vld [vmem:[#allocation3 + $0x18] sm:$0xff] }
  0x4f   :  { %95 = vst [vmem:[#allocation2 + $0x19] sm:$0xff] %v2434_v18  ;;  %96 = vst [vmem:[#allocation2 + $0x21] sm:$0xff] %v2436_v19  ;;  %v1874_v20 = vpack.c.bf16 %v150_v17, %v149_v16  ;;  %v151_v23 = vld [vmem:[#allocation6 + $0xd0] sm:$0xff]  ;;  %v152_v24 = vld [vmem:[#allocation6 + $0xd8] sm:$0xff] }
  0x50   :  { %v1878_v28 = vpack.c.bf16 %v152_v24, %v151_v23  ;;  %v153_v29 = vld [vmem:[#allocation6 + $0xe0] sm:$0xff]  ;;  %v154_v30 = vld [vmem:[#allocation6 + $0xe8] sm:$0xff]  ;;  %v472_v33 = vld [vmem:[#allocation9 + $0x10] sm:$0xff] }
  0x51   :  { %1865 = vmatpush3.bf16.msra.mxu0 %v1862_v7  ;;  %v470_v31 = vld [vmem:[#allocation9] sm:$0xff]  ;;  %v471_v32 = vld [vmem:[#allocation9 + $0x8] sm:$0xff]  ;;  %v473_v34 = vld [vmem:[#allocation9 + $0x18] sm:$0xff]  ;;  %v1882_v35 = vpack.c.bf16 %v154_v30, %v153_v29 }
  0x52   :  { %1867 = vmatprep.subr.bf16.mxu0 %v1866_v10  ;;  %v2447_v36 = vpack.c.bf16 %v471_v32, %v470_v31  ;;  %v155_v37 = vld [vmem:[#allocation6 + $0xf0] sm:$0xff]  ;;  %v156_v38 = vld [vmem:[#allocation6 + $0xf8] sm:$0xff]  ;;  %v2450_v39 = vpack.c.bf16 %v473_v34, %v472_v33  ;;  %v474_v40 = vld [vmem:[#allocation9 + $0x20] sm:$0xff] }
  0x53   :  { %v475_v41 = vld [vmem:[#allocation9 + $0x28] sm:$0xff]  ;;  %v1886_v42 = vpack.c.bf16 %v156_v38, %v155_v37  ;;  %v103_v43 = vld [vmem:[#allocation6] sm:$0xff]  ;;  %v105_v54 = vld [vmem:[#allocation6 + $0x10] sm:$0xff] }
  0x54   :  { %v2440_v21 = vld [vmem:[#allocation2] sm:$0xff]  ;;  %v2442_v22 = vld [vmem:[#allocation2 + $0x8] sm:$0xff]  ;;  %1956 = vmatpush3.bf16.msra.mxu1 %v2447_v36  ;;  %v2453_v44 = vld [vmem:[#allocation2 + $0x10] sm:$0x3]  ;;  %v2460_v48 = vpack.c.bf16 %v475_v41, %v474_v40 }
  0x55   :  { %1869 = vmatpush3.bf16.msra.mxu0 %v1866_v10  ;;  %v126_v25 = vrot.slane %v2440_v21, 1  ;;  %v127_v26 = vrot.slane %v2442_v22, 1  ;;  %1957 = vmatprep.subr.bf16.mxu1 %v2301_v1  ;;  %v104_v45 = vld [vmem:[#allocation6 + $0x8] sm:$0xff]  ;;  %v129_v49 = vrot.slane %v2453_v44, 1  ;;  %v106_v55 = vld [vmem:[#allocation6 + $0x18] sm:$0xff]  ;;  %v107_v60 = vld [vmem:[#allocation6 + $0x20] sm:$0xff] }
  0x56   :  { %1871 = vmatprep.subr.bf16.mxu0 %v1870_v15  ;;  %v2455_v46 = vld [vmem:[#allocation2 + $0x18] sm:$0xff]  ;;  %v2457_v47 = vld [vmem:[#allocation2 + $0x20] sm:$0xff]  ;;  %v1890_v50 = vpack.c.bf16 %v104_v45, %v103_v43  ;;  %v2466_v53 = vld [vmem:[#allocation2 + $0x28] sm:$0x3]  ;;  %v1894_v58 = vpack.c.bf16 %v106_v55, %v105_v54  ;;  %v328_v29 = vrot.slane %v2440_v21, 2  ;;  %v329_v30 = vrot.slane %v2442_v22, 2 }
  0x57   :  { %v128_v27 = vsel %vm125_vm0, %v126_v25, %v127_v26  ;;  %v131_v51 = vrot.slane %v2455_v46, 1  ;;  %v132_v52 = vrot.slane %v2457_v47, 1  ;;  %v130_v56 = vsel %vm125_vm0, %v127_v26, %v129_v49  ;;  %v108_v61 = vld [vmem:[#allocation6 + $0x28] sm:$0xff]  ;;  %v109_v2 = vld [vmem:[#allocation6 + $0x30] sm:$0xff]  ;;  %v110_v3 = vld [vmem:[#allocation6 + $0x38] sm:$0xff] }
  0x58   :  { %1522 = vmatprep.mubr.f32.mxu0 %v128_v27  ;;  %1959 = vmatpush3.bf16.msra.mxu1 %v2450_v39  ;;  %v134_v57 = vrot.slane %v2466_v53, 1  ;;  %v1898_v63 = vpack.c.bf16 %v108_v61, %v107_v60  ;;  %v1902_v4 = vpack.c.bf16 %v110_v3, %v109_v2  ;;  %v111_v5 = vld [vmem:[#allocation6 + $0x40] sm:$0xff]  ;;  %v112_v6 = vld [vmem:[#allocation6 + $0x48] sm:$0xff]  ;;  %v113_v8 = vld [vmem:[#allocation6 + $0x50] sm:$0xff]  ;;  %v330_v34 = vsel %vm327_vm1, %v328_v29, %v329_v30 }
  0x59   :  { %1873 = vmatpush3.bf16.msra.mxu0 %v1870_v15  ;;  %1960 = vmatprep.subr.bf16.mxu1 %v2301_v1  ;;  %v133_v59 = vsel %vm125_vm0, %v131_v51, %v132_v52  ;;  %v1906_v7 = vpack.c.bf16 %v112_v6, %v111_v5  ;;  %v114_v9 = vld [vmem:[#allocation6 + $0x58] sm:$0xff]  ;;  %v115_v13 = vld [vmem:[#allocation6 + $0x60] sm:$0xff]  ;;  %v116_v14 = vld [vmem:[#allocation6 + $0x68] sm:$0xff]  ;;  %v331_v55 = vrot.slane %v2453_v44, 2 }
  0x5a   :  { %1875 = vmatprep.subr.bf16.mxu0 %v1874_v20  ;;  %v135_v62 = vsel %vm125_vm0, %v132_v52, %v134_v57  ;;  %v1910_v10 = vpack.c.bf16 %v114_v9, %v113_v8  ;;  %v1914_v15 = vpack.c.bf16 %v116_v14, %v115_v13  ;;  %v117_v16 = vld [vmem:[#allocation6 + $0x70] sm:$0xff]  ;;  %v118_v17 = vld [vmem:[#allocation6 + $0x78] sm:$0xff]  ;;  %v343_v23 = vld [vmem:[#allocation6 + $0x100] sm:$0xff]  ;;  %v334_v57 = vrot.slane %v2457_v47, 2 }
  0x5b   :  { %v344_v24 = vld [vmem:[#allocation6 + $0x108] sm:$0xff]  ;;  %v345_v26 = vld [vmem:[#allocation6 + $0x110] sm:$0xff]  ;;  %v346_v27 = vld [vmem:[#allocation6 + $0x118] sm:$0xff] }
  0x5c   :  { %1962 = vmatpush3.bf16.msra.mxu1 %v2460_v48  ;;  %v1922_v25 = vpack.c.bf16 %v344_v24, %v343_v23  ;;  %v347_v31 = vld [vmem:[#allocation6 + $0x120] sm:$0xff]  ;;  %v348_v32 = vld [vmem:[#allocation6 + $0x128] sm:$0xff]  ;;  %v350_v37 = vld [vmem:[#allocation6 + $0x138] sm:$0xff] }
  0x5d   :  { %1877 = vmatpush3.bf16.msra.mxu0 %v1874_v20  ;;  %1963 = vmatprep.subr.bf16.mxu1 %v2301_v1  ;;  %v1918_v20 = vpack.c.bf16 %v118_v17, %v117_v16  ;;  %v1930_v33 = vpack.c.bf16 %v348_v32, %v347_v31  ;;  %v351_v38 = vld [vmem:[#allocation6 + $0x140] sm:$0xff]  ;;  %v352_v40 = vld [vmem:[#allocation6 + $0x148] sm:$0xff]  ;;  %v353_v41 = vld [vmem:[#allocation6 + $0x150] sm:$0xff] }
  0x5e   :  { %1879 = vmatprep.subr.bf16.mxu0 %v1878_v28  ;;  %v355_v45 = vld [vmem:[#allocation6 + $0x160] sm:$0xff]  ;;  %v356_v49 = vld [vmem:[#allocation6 + $0x168] sm:$0xff]  ;;  %v357_v51 = vld [vmem:[#allocation6 + $0x170] sm:$0xff] }
  0x5f   :  { %v358_v52 = vld [vmem:[#allocation6 + $0x178] sm:$0xff]  ;;  %v476_v44 = vld [vmem:[#allocation9 + $0x30] sm:$0xff]  ;;  %v482_v5 = vld [vmem:[#allocation9 + $0x60] sm:$0xff] }
  0x60   :  { %v1950_v54 = vpack.c.bf16 %v358_v52, %v357_v51  ;;  %v480_v2 = vld [vmem:[#allocation9 + $0x50] sm:$0xff]  ;;  %v481_v3 = vld [vmem:[#allocation9 + $0x58] sm:$0xff]  ;;  %v483_v6 = vld [vmem:[#allocation9 + $0x68] sm:$0xff] }
  0x61   :  { %1881 = vmatpush3.bf16.msra.mxu0 %v1878_v28  ;;  %v1926_v28 = vpack.c.bf16 %v346_v27, %v345_v26  ;;  %v484_v8 = vld [vmem:[#allocation9 + $0x70] sm:$0xff]  ;;  %v485_v9 = vld [vmem:[#allocation9 + $0x78] sm:$0xff] }
  0x62   :  { %1883 = vmatprep.subr.bf16.mxu0 %v1882_v35  ;;  %v733_v51 = vld [vmem:[#allocation8 + $0x98] sm:$0xff] }
  0x65   :  { %1885 = vmatpush3.bf16.msra.mxu0 %v1882_v35  ;;  %v349_v35 = vld [vmem:[#allocation6 + $0x130] sm:$0xff] }
  0x66   :  { %1887 = vmatprep.subr.bf16.mxu0 %v1886_v42 }
  0x69   :  { %1889 = vmatpush3.bf16.msra.mxu0 %v1886_v42  ;;  %v354_v42 = vld [vmem:[#allocation6 + $0x158] sm:$0xff] }
  0x6a   :  { %1891 = vmatprep.subr.bf16.mxu0 %v1890_v50  ;;  %v1942_v43 = vpack.c.bf16 %v354_v42, %v353_v41 }
  0x6c   :  { %1523 = vmatmul.mubr.f32.vlgmr.msra.gmra.mrb[0].mxu0 %v130_v56  ;;  %v333_v56 = vrot.slane %v2455_v46, 2 }
  0x6d   :  { %1893 = vmatpush3.bf16.msra.mxu0 %v1890_v50  ;;  %1525 = vmatprep.mubr.f32.mxu0 %v133_v59  ;;  %v1946_v50 = vpack.c.bf16 %v356_v49, %v355_v45  ;;  %v336_v59 = vrot.slane %v2466_v53, 2  ;;  %v478_v53 = vld [vmem:[#allocation9 + $0x40] sm:$0xff]  ;;  %v731_v45 = vld [vmem:[#allocation8 + $0x88] sm:$0xff] }
  0x6e   :  { %1895 = vmatprep.subr.bf16.mxu0 %v1894_v58  ;;  %v335_v60 = vsel %vm327_vm1, %v333_v56, %v334_v57 }
  0x6f   :  { %v337_v61 = vsel %vm327_vm1, %v334_v57, %v336_v59  ;;  %v736_v57 = vld [vmem:[#allocation8 + $0xb0] sm:$0xff] }
  0x70   :  { %1526 = vmatmul.mubr.f32.gmra.mrb[2].mxu0 %v135_v62  ;;  %v479_v62 = vld [vmem:[#allocation9 + $0x48] sm:$0xff] }
  0x71   :  { %1897 = vmatpush3.bf16.msra.mxu0 %v1894_v58  ;;  %1560 = vmatprep.mubr.f32.mxu0 %v2440_v21  ;;  %v1934_v21 = vpack.c.bf16 %v350_v37, %v349_v35  ;;  %v332_v58 = vsel %vm327_vm1, %v329_v30, %v331_v55  ;;  %v735_v55 = vld [vmem:[#allocation8 + $0xa8] sm:$0xff] }
  0x72   :  { %1899 = vmatprep.subr.bf16.mxu0 %v1898_v63 }
  0x75   :  { %1901 = vmatpush3.bf16.msra.mxu0 %v1898_v63  ;;  %v2501_v63 = vpack.c.bf16 %v479_v62, %v478_v53  ;;  %v741_v53 = vld [vmem:[#allocation8 + $0xd8] sm:$0xff] }
  0x76   :  { %1903 = vmatprep.subr.bf16.mxu0 %v1902_v4 }
  0x79   :  { %1905 = vmatpush3.bf16.msra.mxu0 %v1902_v4  ;;  %v2507_v4 = vpack.c.bf16 %v481_v3, %v480_v2  ;;  %v742_v2 = vld [vmem:[#allocation8 + $0xe0] sm:$0xff]  ;;  %v743_v3 = vld [vmem:[#allocation8 + $0xe8] sm:$0xff] }
  0x7a   :  { %1907 = vmatprep.subr.bf16.mxu0 %v1906_v7 }
  0x7d   :  { %1909 = vmatpush3.bf16.msra.mxu0 %v1906_v7  ;;  %v2513_v7 = vpack.c.bf16 %v483_v6, %v482_v5  ;;  %v744_v5 = vld [vmem:[#allocation8 + $0xf0] sm:$0xff]  ;;  %v2026_v6 = vpack.c.bf16 %v743_v3, %v742_v2 }
  0x7e   :  { %1911 = vmatprep.subr.bf16.mxu0 %v1910_v10  ;;  %v695_v3 = vld [vmem:[#allocation8 + $0x10] sm:$0xff] }
  0x81   :  { %1913 = vmatpush3.bf16.msra.mxu0 %v1910_v10  ;;  %v2518_v10 = vpack.c.bf16 %v485_v9, %v484_v8  ;;  %v745_v8 = vld [vmem:[#allocation8 + $0xf8] sm:$0xff] }
  0x82   :  { %1915 = vmatprep.subr.bf16.mxu0 %v1914_v15  ;;  %v2030_v9 = vpack.c.bf16 %v745_v8, %v744_v5  ;;  %v696_v5 = vld [vmem:[#allocation8 + $0x18] sm:$0xff] }
  0x85   :  { %1917 = vmatpush3.bf16.msra.mxu0 %v1914_v15 }
  0x86   :  { %1919 = vmatprep.subr.bf16.mxu0 %v1918_v20 }
  0x89   :  { %1921 = vmatpush3.bf16.msra.mxu0 %v1918_v20 }
  0x8a   :  { %1923 = vmatprep.subr.bf16.mxu0 %v1922_v25 }
  0x8c   :  { %1561 = vmatmul.mubr.f32.vlgmr.msra.gmra.mrb[0].mxu0 %v2442_v22  ;;  %v1938_v22 = vpack.c.bf16 %v352_v40, %v351_v38 }
  0x8d   :  { %1925 = vmatpush3.bf16.msra.mxu0 %v1922_v25  ;;  %1563 = vmatprep.mubr.f32.mxu0 %v2455_v46  ;;  %v477_v46 = vld [vmem:[#allocation9 + $0x38] sm:$0xff] }
  0x8e   :  { %1927 = vmatprep.subr.bf16.mxu0 %v1926_v28 }
  0x90   :  { %1564 = vmatmul.mubr.f32.gmra.mrb[2].mxu0 %v2457_v47  ;;  %v2495_v47 = vpack.c.bf16 %v477_v46, %v476_v44  ;;  %v740_v46 = vld [vmem:[#allocation8 + $0xd0] sm:$0xff] }
  0x91   :  { %1929 = vmatpush3.bf16.msra.mxu0 %v1926_v28  ;;  %1598 = vmatprep.mubr.f32.mxu0 %v330_v34  ;;  %v2022_v62 = vpack.c.bf16 %v741_v53, %v740_v46 }
  0x92   :  { %1931 = vmatprep.subr.bf16.mxu0 %v1930_v33  ;;  %1965 = vmatpush3.bf16.msra.mxu1 %v2495_v47 }
  0x93   :  { %1966 = vmatprep.subr.bf16.mxu1 %v2301_v1 }
  0x95   :  { %1933 = vmatpush3.bf16.msra.mxu0 %v1930_v33 }
  0x96   :  { %1935 = vmatprep.subr.bf16.mxu0 %v1934_v21  ;;  %1968 = vmatpush3.bf16.msra.mxu1 %v2501_v63 }
  0x97   :  { %1969 = vmatprep.subr.bf16.mxu1 %v2301_v1 }
  0x99   :  { %1937 = vmatpush3.bf16.msra.mxu0 %v1934_v21 }
  0x9a   :  { %1939 = vmatprep.subr.bf16.mxu0 %v1938_v22  ;;  %1971 = vmatpush3.bf16.msra.mxu1 %v2507_v4 }
  0x9b   :  { %1972 = vmatprep.subr.bf16.mxu1 %v2301_v1 }
  0x9d   :  { %1941 = vmatpush3.bf16.msra.mxu0 %v1938_v22 }
  0x9e   :  { %1943 = vmatprep.subr.bf16.mxu0 %v1942_v43  ;;  %1974 = vmatpush3.bf16.msra.mxu1 %v2513_v7 }
  0x9f   :  { %1975 = vmatprep.subr.bf16.mxu1 %v2301_v1 }
  0xa1   :  { %1945 = vmatpush3.bf16.msra.mxu0 %v1942_v43  ;;  %v730_v43 = vld [vmem:[#allocation8 + $0x80] sm:$0xff] }
  0xa2   :  { %1947 = vmatprep.subr.bf16.mxu0 %v1946_v50  ;;  %1977 = vmatpush3.bf16.msra.mxu1 %v2518_v10  ;;  %v2002_v49 = vpack.c.bf16 %v731_v45, %v730_v43 }
  0xa3   :  { %1978 = vmatprep.subr.bf16.mxu1 %v2301_v1 }
  0xa5   :  { %1949 = vmatpush3.bf16.msra.mxu0 %v1946_v50  ;;  %v732_v50 = vld [vmem:[#allocation8 + $0x90] sm:$0xff] }
  0xa6   :  { %1951 = vmatprep.subr.bf16.mxu0 %v1950_v54  ;;  %v2006_v52 = vpack.c.bf16 %v733_v51, %v732_v50 }
  0xa9   :  { %1953 = vmatpush3.bf16.msra.mxu0 %v1950_v54  ;;  %v734_v54 = vld [vmem:[#allocation8 + $0xa0] sm:$0xff] }
  0xaa   :  { %2098 = vmatprep.subr.bf16.mxu0 %v2301_v1  ;;  %v2010_v56 = vpack.c.bf16 %v735_v55, %v734_v54 }
  0xac   :  { %1599 = vmatmul.mubr.f32.vlgmr.msra.gmra.mrb[0].mxu0 %v332_v58  ;;  %v737_v58 = vld [vmem:[#allocation8 + $0xb8] sm:$0xff] }
  0xad   :  { %1601 = vmatprep.mubr.f32.mxu0 %v335_v60  ;;  %2100 = vmatpush3.bf16.msra.mxu0 %v2447_v36  ;;  %v2014_v59 = vpack.c.bf16 %v737_v58, %v736_v57  ;;  %v738_v60 = vld [vmem:[#allocation8 + $0xc0] sm:$0xff] }
  0xae   :  { %2101 = vmatprep.subr.bf16.mxu0 %v2301_v1 }
  0xb0   :  { %1602 = vmatmul.mubr.f32.gmra.mrb[2].mxu0 %v337_v61  ;;  %v739_v61 = vld [vmem:[#allocation8 + $0xc8] sm:$0xff] }
  0xb1   :  { %2103 = vmatpush3.bf16.msra.mxu0 %v2450_v39  ;;  %1820 = vmatprep.mubr.msk.f32.mxu0 %vm2302_vm2, %v2300_v0  ;;  %v2018_v44 = vpack.c.bf16 %v739_v61, %v738_v60 }
  0xb2   :  { %2104 = vmatprep.subr.bf16.mxu0 %v2301_v1 }
  0xb5   :  { %2106 = vmatpush3.bf16.msra.mxu0 %v2460_v48 }
  0xb6   :  { %2107 = vmatprep.subr.bf16.mxu0 %v2301_v1 }
  0xb9   :  { %2109 = vmatpush3.bf16.msra.mxu0 %v2495_v47 }
  0xba   :  { %2110 = vmatprep.subr.bf16.mxu0 %v2301_v1 }
  0xbd   :  { %2112 = vmatpush3.bf16.msra.mxu0 %v2501_v63 }
  0xbe   :  { %2113 = vmatprep.subr.bf16.mxu0 %v2301_v1 }
  0xc1   :  { %2115 = vmatpush3.bf16.msra.mxu0 %v2507_v4 }
  0xc2   :  { %2116 = vmatprep.subr.bf16.mxu0 %v2301_v1 }
  0xc5   :  { %2118 = vmatpush3.bf16.msra.mxu0 %v2513_v7 }
  0xc6   :  { %2119 = vmatprep.subr.bf16.mxu0 %v2301_v1 }
  0xc9   :  { %2121 = vmatpush3.bf16.msra.mxu0 %v2518_v10 }
  0xca   :  { %2122 = vmatprep.subr.bf16.mxu0 %v2301_v1 }
 0x17f   :  { %v2529_v13 = vpop.f32.mrb[0].mxu0 }
 0x180   :  { %v458_v14 = vmul.f32 %v2529_v13, %v2529_v13  ;;  %v2533_v15 = vpop.f32.mrb[1].mxu0 }
 0x181   :  { %v448_v16 = vadd.f32 %v2529_v13, %v2533_v15  ;;  %v457_v17 = vmul.f32 %v2533_v15, %v2533_v15 }
 0x183   :  { %v461_v20 = vadd.f32 %v458_v14, %v457_v17  ;;  %v2539_v23 = vpop.f32.mrb[2].mxu0  ;;  %v693_v14 = vld [vmem:[#allocation8] sm:$0xff] }
 0x184   :  { %v2541_v24 = vpop.f32.mrb[3].mxu0  ;;  %v460_v27 = vmul.f32 %v2539_v23, %v2539_v23 }
 0x185   :  { %v449_v25 = vadd.f32 %v448_v16, %v2541_v24  ;;  %v459_v26 = vmul.f32 %v2541_v24, %v2541_v24  ;;  %v694_v16 = vld [vmem:[#allocation8 + $0x8] sm:$0xff] }
 0x186   :  { %v2566_v17 = vpack.c.bf16 %v694_v16, %v693_v14 }
 0x187   :  { %v450_v28 = vadd.f32 %v2539_v23, %v449_v25  ;;  %v462_v29 = vadd.f32 %v461_v20, %v459_v26  ;;  %v631_v20 = vlaneseq }
 0x189   :  { %v451_v30 = vrot.slane %v450_v28, 4  ;;  %v463_v31 = vadd.f32 %v462_v29, %v460_v27  ;;  %v632_v25 = vshrl.u32 %v631_v20, 7 }
 0x18b   :  { %v452_v32 = vadd.f32 %v451_v30, %v450_v28  ;;  %v464_v21 = vrot.slane %v463_v31, 4  ;;  %v2569_v26 = vsub.s32 0, %v632_v25 }
 0x18d   :  { %v453_v33 = vrot.slane %v452_v32, 2  ;;  %v465_v38 = vadd.f32 %v464_v21, %v463_v31 }
 0x18f   :  { %v454_v34 = vadd.f32 %v453_v33, %v452_v32  ;;  %v466_v40 = vrot.slane %v465_v38, 2 }
 0x191   :  { %v455_v35 = vrot.slane %v454_v34, 1  ;;  %v467_v22 = vadd.f32 %v466_v40, %v465_v38 }
 0x193   :  { %v456_v37 = vadd.f32 %v455_v35, %v454_v34  ;;  %v468_v41 = vrot.slane %v467_v22, 1 }
 0x195   :  { %1637 = vmatmul.mubr.f32.vlgmr.msra.gmra.mrb[0].mxu1 %v456_v37  ;;  %v469_v42 = vadd.f32 %v468_v41, %v467_v22 }
 0x196   :  { %1980 = vmatpush3.bf16.msra.mxu1 %v2447_v36  ;;  %1671 = vmatprep.mubr.msk.f32.mxu1 %vm2302_vm2, %v2300_v0 }
 0x197   :  { %1981 = vmatprep.subr.bf16.mxu1 %v2301_v1 }
 0x19a   :  { %1983 = vmatpush3.bf16.msra.mxu1 %v2450_v39 }
 0x19b   :  { %1984 = vmatprep.subr.bf16.mxu1 %v2301_v1 }
 0x19e   :  { %1986 = vmatpush3.bf16.msra.mxu1 %v2460_v48 }
 0x19f   :  { %1987 = vmatprep.subr.bf16.mxu1 %v2301_v1 }
 0x1a2   :  { %1989 = vmatpush3.bf16.msra.mxu1 %v2495_v47 }
 0x1a3   :  { %1990 = vmatprep.subr.bf16.mxu1 %v2301_v1 }
 0x1a6   :  { %1992 = vmatpush3.bf16.msra.mxu1 %v2501_v63 }
 0x1a7   :  { %1993 = vmatprep.subr.bf16.mxu1 %v2301_v1 }
 0x1aa   :  { %1995 = vmatpush3.bf16.msra.mxu1 %v2507_v4 }
 0x1ab   :  { %1996 = vmatprep.subr.bf16.mxu1 %v2301_v1 }
 0x1ae   :  { %1998 = vmatpush3.bf16.msra.mxu1 %v2513_v7 }
 0x1af   :  { %1999 = vmatprep.subr.bf16.mxu1 %v2301_v1 }
 0x1b2   :  { %2001 = vmatpush3.bf16.msra.mxu1 %v2518_v10 }
 0x1b3   :  { %2003 = vmatprep.subr.bf16.mxu1 %v2002_v49 }
 0x1b5   :  { %1672 = vmatmul.mubr.f32.vlgmr.msra.gmra.mrb[2].mxu1 %v469_v42 }
 0x1b6   :  { %2005 = vmatpush3.bf16.msra.mxu1 %v2002_v49 }
 0x1b7   :  { %2007 = vmatprep.subr.bf16.mxu1 %v2006_v52 }
 0x1ba   :  { %2009 = vmatpush3.bf16.msra.mxu1 %v2006_v52 }
 0x1bb   :  { %2011 = vmatprep.subr.bf16.mxu1 %v2010_v56 }
 0x1be   :  { %2013 = vmatpush3.bf16.msra.mxu1 %v2010_v56 }
 0x1bf   :  { %2015 = vmatprep.subr.bf16.mxu1 %v2014_v59 }
 0x1c2   :  { %2017 = vmatpush3.bf16.msra.mxu1 %v2014_v59 }
 0x1c3   :  { %2019 = vmatprep.subr.bf16.mxu1 %v2018_v44 }
 0x1c6   :  { %2021 = vmatpush3.bf16.msra.mxu1 %v2018_v44 }
 0x1c7   :  { %2023 = vmatprep.subr.bf16.mxu1 %v2022_v62 }
 0x1ca   :  { %2025 = vmatpush3.bf16.msra.mxu1 %v2022_v62 }
 0x1cb   :  { %2027 = vmatprep.subr.bf16.mxu1 %v2026_v6 }
 0x1ce   :  { %2029 = vmatpush3.bf16.msra.mxu1 %v2026_v6 }
 0x1cf   :  { %2031 = vmatprep.subr.bf16.mxu1 %v2030_v9 }
 0x1d2   :  { %2033 = vmatpush3.bf16.msra.mxu1 %v2030_v9 }
 0x1d3   :  { %2035 = vmatprep.subr.bf16.mxu1 %v2566_v17 }
 0x268   :  { %v552_v27 = vpop.f32.mrb[0].mxu1 }
 0x269   :  { %v556_v28 = vmul.f32 0.001953125, %v552_v27  ;;  %v1638_v29 = vpop.f32.mrb[1].mxu1 }
 0x26b   :  { %v634_v30 = vrot.slane %v556_v28, %v2569_v26  ;;  %v628_v37 = vmul.f32 %v556_v28, %v556_v28 }
 0x26d   :  { %v635_v31 = vsub.f32 %v2533_v15, %v634_v30  ;;  %v636_v32 = vsub.f32 %v2529_v13, %v634_v30  ;;  %v637_v33 = vsub.f32 %v2541_v24, %v634_v30  ;;  %v638_v34 = vsub.f32 %v2539_v23, %v634_v30  ;;  %v1298_v15 = vld [vmem:[%s2676_s4] ss:$0 sm:$0xff] }
 0x26e   :  { %v1299_v23 = vld [vmem:[%s2677_s5] ss:$0 sm:$0xff] }
 0x288   :  { %v623_v35 = vpop.f32.mrb[2].mxu1 }
 0x289   :  { %v627_v21 = vmul.f32 0.001953125, %v623_v35  ;;  %v1673_v38 = vpop.f32.mrb[3].mxu1 }
 0x28b   :  { %v629_v40 = vsub.f32 %v627_v21, %v628_v37  ;;  %v697_v37 = vld [vmem:[#allocation8 + $0x20] sm:$0xff]  ;;  %v698_v21 = vld [vmem:[#allocation8 + $0x28] sm:$0xff] }
 0x28d   :  { %v630_v22 = vmax.f32 %v629_v40, 0.0 }
 0x28f   :  { %v639_v41 = vadd.f32 1e-05, %v630_v22 }
 0x291   :  { %2172 = vrsqrt.f32 %v639_v41 }
 0x29b   :  { %v2173_v42 = vpop.eup %2172 }
 0x29c   :  { %v644_v43 = vrot.slane %v2173_v42, %v2569_v26  ;;  %v2042_v42 = vpack.c.bf16 %v698_v21, %v697_v37  ;;  %v945_v37 = vld [vmem:[#allocation8 + $0x170] sm:$0xff]  ;;  %v946_v21 = vld [vmem:[#allocation8 + $0x178] sm:$0xff] }
 0x29e   :  { %v645_v13 = vmul.f32 %v644_v43, %v635_v31  ;;  %v646_v45 = vmul.f32 %v644_v43, %v636_v32  ;;  %v647_v24 = vmul.f32 %v644_v43, %v637_v33  ;;  %v648_v49 = vmul.f32 %v644_v43, %v638_v34 }
 0x29f   :  { %v2038_v33 = vpack.c.bf16 %v696_v5, %v695_v3  ;;  %v936_v3 = vld [vmem:[#allocation8 + $0x128] sm:$0xff] }
 0x2a0   :  { %v656_v50 = vmul.f32 %v1298_v15, %v645_v13  ;;  %v657_v51 = vmul.f32 %v1298_v15, %v646_v45  ;;  %v658_v52 = vmul.f32 %v1298_v15, %v647_v24  ;;  %v659_v54 = vmul.f32 %v1298_v15, %v648_v49  ;;  %v699_v13 = vld [vmem:[#allocation8 + $0x30] sm:$0xff]  ;;  %v700_v45 = vld [vmem:[#allocation8 + $0x38] sm:$0xff]  ;;  %v702_v49 = vld [vmem:[#allocation8 + $0x48] sm:$0xff] }
 0x2a1   :  { %v2046_v24 = vpack.c.bf16 %v700_v45, %v699_v13 }
 0x2a2   :  { %v667_v55 = vadd.f32 %v1299_v23, %v656_v50  ;;  %v668_v56 = vadd.f32 %v1299_v23, %v657_v51  ;;  %v669_v57 = vadd.f32 %v1299_v23, %v658_v52  ;;  %v670_v58 = vadd.f32 %v1299_v23, %v659_v54  ;;  %v703_v50 = vld [vmem:[#allocation8 + $0x50] sm:$0xff]  ;;  %v704_v51 = vld [vmem:[#allocation8 + $0x58] sm:$0xff]  ;;  %v705_v54 = vld [vmem:[#allocation8 + $0x60] sm:$0xff] }
 0x2a3   :  { %v2054_v52 = vpack.c.bf16 %v704_v51, %v703_v50 }
 0x2a4   :  { %vm671_vm3 = vcmp.gt.f32.partialorder %v667_v55, 0.0  ;;  %vm672_vm4 = vcmp.gt.f32.partialorder %v668_v56, 0.0  ;;  %vm673_vm5 = vcmp.gt.f32.partialorder %v669_v57, 0.0  ;;  %vm674_vm6 = vcmp.gt.f32.partialorder %v670_v58, 0.0 }
 0x2a5   :  { %v675_v59 = vmul.f32 0.01, %v667_v55  ;;  %v676_v60 = vmul.f32 0.01, %v668_v56  ;;  %v677_v61 = vmul.f32 0.01, %v669_v57 }
 0x2a6   :  { %v678_v44 = vmul.f32 0.01, %v670_v58 }
 0x2a7   :  { %v679_v46 = vsel %vm671_vm3, %v667_v55, %v675_v59  ;;  %v680_v53 = vsel %vm672_vm4, %v668_v56, %v676_v60  ;;  %v681_v62 = vsel %vm673_vm5, %v669_v57, %v677_v61  ;;  %v706_v55 = vld [vmem:[#allocation8 + $0x68] sm:$0xff]  ;;  %v707_v57 = vld [vmem:[#allocation8 + $0x70] sm:$0xff]  ;;  %v931_v60 = vld [vmem:[#allocation8 + $0x100] sm:$0xff] }
 0x2a8   :  { %v682_v2 = vsel %vm674_vm6, %v670_v58, %v678_v44  ;;  %683 = vst [vmem:[#allocation2 + $0x1] sm:$0xff] %v679_v46  ;;  %684 = vst [vmem:[#allocation2 + $0x9] sm:$0xff] %v680_v53  ;;  %v2058_v56 = vpack.c.bf16 %v706_v55, %v705_v54  ;;  %v708_v58 = vld [vmem:[#allocation8 + $0x78] sm:$0xff]  ;;  %v932_v61 = vld [vmem:[#allocation8 + $0x108] sm:$0xff] }
 0x2a9   :  { %685 = vst [vmem:[#allocation2 + $0x19] sm:$0xff] %v681_v62  ;;  %686 = vst [vmem:[#allocation2 + $0x21] sm:$0xff] %v682_v2  ;;  %v2062_v59 = vpack.c.bf16 %v708_v58, %v707_v57  ;;  %v2066_v44 = vpack.c.bf16 %v932_v61, %v931_v60  ;;  %v933_v46 = vld [vmem:[#allocation8 + $0x110] sm:$0xff]  ;;  %v934_v53 = vld [vmem:[#allocation8 + $0x118] sm:$0xff] }
 0x2aa   :  { %v2070_v62 = vpack.c.bf16 %v934_v53, %v933_v46  ;;  %v935_v2 = vld [vmem:[#allocation8 + $0x120] sm:$0xff] }
 0x2af   :  { %v2583_v6 = vld [vmem:[#allocation2] sm:$0xff]  ;;  %v2585_v8 = vld [vmem:[#allocation2 + $0x8] sm:$0xff]  ;;  %v2587_v9 = vld [vmem:[#allocation2 + $0x10] sm:$0x3] }
 0x2b0   :  { %v715_v14 = vrot.slane %v2583_v6, 1  ;;  %v716_v16 = vrot.slane %v2585_v8, 1  ;;  %v718_v20 = vrot.slane %v2587_v9, 1  ;;  %v2592_v25 = vld [vmem:[#allocation2 + $0x18] sm:$0xff]  ;;  %v2594_v27 = vld [vmem:[#allocation2 + $0x20] sm:$0xff]  ;;  %v916_v5 = vrot.slane %v2583_v6, 2 }
 0x2b1   :  { %v720_v28 = vrot.slane %v2592_v25, 1  ;;  %v721_v29 = vrot.slane %v2594_v27, 1  ;;  %v692_v30 = vld [vmem:[#allocation2 + $0x28] sm:$0x3]  ;;  %v921_v34 = vrot.slane %v2592_v25, 2  ;;  %v922_v38 = vrot.slane %v2594_v27, 2 }
 0x2b2   :  { %v717_v31 = vsel %vm125_vm0, %v715_v14, %v716_v16  ;;  %v719_v32 = vsel %vm125_vm0, %v716_v16, %v718_v20  ;;  %v723_v35 = vrot.slane %v692_v30, 1  ;;  %v924_v22 = vrot.slane %v692_v30, 2  ;;  %v937_v20 = vld [vmem:[#allocation8 + $0x130] sm:$0xff] }
 0x2b3   :  { %1706 = vmatprep.mubr.f32.mxu1 %v717_v31  ;;  %v722_v40 = vsel %vm125_vm0, %v720_v28, %v721_v29  ;;  %v2605_v41 = vsel %vm327_vm1, %v921_v34, %v922_v38  ;;  %v917_v14 = vrot.slane %v2585_v8, 2  ;;  %v2074_v16 = vpack.c.bf16 %v936_v3, %v935_v2  ;;  %v938_v28 = vld [vmem:[#allocation8 + $0x138] sm:$0xff]  ;;  %v939_v31 = vld [vmem:[#allocation8 + $0x140] sm:$0xff] }
 0x2b4   :  { %1707 = vmatmul.mubr.f32.vlgmr.msra.gmra.mrb[4].mxu1 %v719_v32  ;;  %v2608_v43 = vsel %vm327_vm1, %v922_v38, %v924_v22  ;;  %v724_v15 = vsel %vm125_vm0, %v721_v29, %v723_v35  ;;  %v2078_v30 = vpack.c.bf16 %v938_v28, %v937_v20  ;;  %v940_v32 = vld [vmem:[#allocation8 + $0x148] sm:$0xff]  ;;  %v943_v34 = vld [vmem:[#allocation8 + $0x160] sm:$0xff]  ;;  %v2094_v38 = vpack.c.bf16 %v946_v21, %v945_v37 }
 0x2b5   :  { %2037 = vmatpush3.bf16.msra.mxu1 %v2566_v17  ;;  %1709 = vmatprep.mubr.f32.mxu1 %v722_v40  ;;  %v701_v17 = vld [vmem:[#allocation8 + $0x40] sm:$0xff]  ;;  %v918_v29 = vsel %vm327_vm1, %v916_v5, %v917_v14  ;;  %v944_v35 = vld [vmem:[#allocation8 + $0x168] sm:$0xff]  ;;  %v919_v40 = vrot.slane %v2587_v9, 2 }
 0x2b6   :  { %2039 = vmatprep.subr.bf16.mxu1 %v2038_v33  ;;  %v2050_v23 = vpack.c.bf16 %v702_v49, %v701_v17 }
 0x2b7   :  { %v920_v22 = vsel %vm327_vm1, %v917_v14, %v919_v40 }
 0x2b8   :  { %1710 = vmatmul.mubr.f32.gmra.mrb[6].mxu1 %v724_v15 }
 0x2b9   :  { %2041 = vmatpush3.bf16.msra.mxu1 %v2038_v33  ;;  %1744 = vmatprep.mubr.f32.mxu1 %v2583_v6  ;;  %v2082_v6 = vpack.c.bf16 %v940_v32, %v939_v31 }
 0x2ba   :  { %2043 = vmatprep.subr.bf16.mxu1 %v2042_v42 }
 0x2bd   :  { %2045 = vmatpush3.bf16.msra.mxu1 %v2042_v42 }
 0x2be   :  { %2047 = vmatprep.subr.bf16.mxu1 %v2046_v24 }
 0x2c1   :  { %2049 = vmatpush3.bf16.msra.mxu1 %v2046_v24 }
 0x2c2   :  { %2051 = vmatprep.subr.bf16.mxu1 %v2050_v23 }
 0x2c5   :  { %2053 = vmatpush3.bf16.msra.mxu1 %v2050_v23 }
 0x2c6   :  { %2055 = vmatprep.subr.bf16.mxu1 %v2054_v52 }
 0x2c9   :  { %2057 = vmatpush3.bf16.msra.mxu1 %v2054_v52 }
 0x2ca   :  { %2059 = vmatprep.subr.bf16.mxu1 %v2058_v56 }
 0x2cd   :  { %2061 = vmatpush3.bf16.msra.mxu1 %v2058_v56 }
 0x2ce   :  { %2063 = vmatprep.subr.bf16.mxu1 %v2062_v59 }
 0x2d1   :  { %2065 = vmatpush3.bf16.msra.mxu1 %v2062_v59 }
 0x2d2   :  { %2067 = vmatprep.subr.bf16.mxu1 %v2066_v44 }
 0x2d4   :  { %1745 = vmatmul.mubr.f32.vlgmr.msra.gmra.mrb[4].mxu1 %v2585_v8  ;;  %v941_v8 = vld [vmem:[#allocation8 + $0x150] sm:$0xff] }
 0x2d5   :  { %1747 = vmatprep.mubr.f32.mxu1 %v2592_v25  ;;  %2069 = vmatpush3.bf16.msra.mxu1 %v2066_v44  ;;  %v942_v25 = vld [vmem:[#allocation8 + $0x158] sm:$0xff] }
 0x2d6   :  { %2071 = vmatprep.subr.bf16.mxu1 %v2070_v62  ;;  %v2086_v33 = vpack.c.bf16 %v942_v25, %v941_v8  ;;  %v1301_v8 = vld [vmem:[%s2679_s7] ss:$0 sm:$0xff] }
 0x2d8   :  { %1748 = vmatmul.mubr.f32.gmra.mrb[6].mxu1 %v2594_v27  ;;  %v2090_v27 = vpack.c.bf16 %v944_v35, %v943_v34 }
 0x2d9   :  { %2073 = vmatpush3.bf16.msra.mxu1 %v2070_v62  ;;  %1782 = vmatprep.mubr.f32.mxu1 %v918_v29  ;;  %v1300_v29 = vld [vmem:[%s2678_s6] ss:$0 sm:$0xff]  ;;  %s2303_s6 = smov [#allocation11]  }
 0x2da   :  { %2075 = vmatprep.subr.bf16.mxu1 %v2074_v16  ;;  %s1284_s7 = sshll.u32 %s2303_s6, 4  ;;  %s1285_s7 = int_to_ptr.vmem [resolvable:$true] %s1284_s7 }
 0x2db   :  { %s2264_s15 = scalar_lea.vmem %s1285_s7, 512  ;;  %p2269_p5 = scmp.lt.s32.totalorder %s1285_s7, %s1285_s7 }
 0x2dc   :  { %p2265_p4 = scmp.ne.s32.totalorder %s1285_s7, %s2264_s15  ;;  %p2270_p6 = scmp.lt.s32.totalorder %s2264_s15, %s2264_s15 }
 0x2dd   :  { %2077 = vmatpush3.bf16.msra.mxu1 %v2074_v16 }
 0x2de   :  { %2079 = vmatprep.subr.bf16.mxu1 %v2078_v30  ;;  %p2271_p7 = por %p2270_p6, %p2269_p5 }
 0x2e0   :  { %p2272_p8 = pnand %p2271_p7, %p2265_p4 }
 0x2e1   :  { %2081 = vmatpush3.bf16.msra.mxu1 %v2078_v30 }
 0x2e2   :  { %2083 = vmatprep.subr.bf16.mxu1 %v2082_v6 }
 0x2e5   :  { %2085 = vmatpush3.bf16.msra.mxu1 %v2082_v6 }
 0x2e6   :  { %2087 = vmatprep.subr.bf16.mxu1 %v2086_v33 }
 0x2e9   :  { %2089 = vmatpush3.bf16.msra.mxu1 %v2086_v33 }
 0x2ea   :  { %2091 = vmatprep.subr.bf16.mxu1 %v2090_v27 }
 0x2ed   :  { %2093 = vmatpush3.bf16.msra.mxu1 %v2090_v27 }
 0x2ee   :  { %2095 = vmatprep.subr.bf16.mxu1 %v2094_v38 }
 0x2f1   :  { %2097 = vmatpush3.bf16.msra.mxu1 %v2094_v38 }
 0x2f4   :  { %1783 = vmatmul.mubr.f32.vlgmr.msra.gmra.mrb[4].mxu1 %v920_v22 }
 0x2f5   :  { %1785 = vmatprep.mubr.f32.mxu1 %v2605_v41 }
 0x2f8   :  { %1786 = vmatmul.mubr.f32.gmra.mrb[6].mxu1 %v2608_v43 }
 0x3c7   :  { %v2622_v42 = vpop.f32.mrb[4].mxu1 }
 0x3c8   :  { %v1046_v15 = vmul.f32 %v2622_v42, %v2622_v42  ;;  %v1013_v13 = vpop.f32.mrb[5].mxu1 }
 0x3c9   :  { %v1036_v45 = vadd.f32 %v2622_v42, %v1013_v13  ;;  %v1045_v24 = vmul.f32 %v1013_v13, %v1013_v13 }
 0x3cb   :  { %v1049_v17 = vadd.f32 %v1046_v15, %v1045_v24  ;;  %v1787_v49 = vpop.f32.mrb[6].mxu1 }
 0x3cc   :  { %v1023_v9 = vpop.f32.mrb[7].mxu1  ;;  %v1048_v51 = vmul.f32 %v1787_v49, %v1787_v49 }
 0x3cd   :  { %v1037_v23 = vadd.f32 %v1036_v45, %v1023_v9  ;;  %v1047_v50 = vmul.f32 %v1023_v9, %v1023_v9 }
 0x3cf   :  { %v1038_v52 = vadd.f32 %v1787_v49, %v1037_v23  ;;  %v1050_v54 = vadd.f32 %v1049_v17, %v1047_v50 }
 0x3d1   :  { %v1039_v41 = vrot.slane %v1038_v52, 4  ;;  %v1051_v55 = vadd.f32 %v1050_v54, %v1048_v51 }
 0x3d3   :  { %v1040_v43 = vadd.f32 %v1039_v41, %v1038_v52  ;;  %v1052_v60 = vrot.slane %v1051_v55, 4 }
 0x3d5   :  { %v1041_v56 = vrot.slane %v1040_v43, 2  ;;  %v1053_v61 = vadd.f32 %v1052_v60, %v1051_v55 }
 0x3d7   :  { %v1042_v57 = vadd.f32 %v1041_v56, %v1040_v43 }
 0x3d9   :  { %v1043_v58 = vrot.slane %v1042_v57, 1 }
 0x3db   :  { %v1044_v59 = vadd.f32 %v1043_v58, %v1042_v57 }
 0x3dd   :  { %1821 = vmatmul.mubr.f32.vlgmr.msra.gmra.mrb[4].mxu0 %v1044_v59 }
 0x3de   :  { %2124 = vmatpush3.bf16.msra.mxu0 %v2447_v36  ;;  %1855 = vmatprep.mubr.msk.f32.mxu0 %vm2302_vm2, %v2300_v0  ;;  %v1054_v36 = vrot.slane %v1053_v61, 2 }
 0x3df   :  { %2125 = vmatprep.subr.bf16.mxu0 %v2301_v1 }
 0x3e0   :  { %v1055_v0 = vadd.f32 %v1054_v36, %v1053_v61 }
 0x3e2   :  { %2127 = vmatpush3.bf16.msra.mxu0 %v2450_v39  ;;  %v1056_v39 = vrot.slane %v1055_v0, 1 }
 0x3e3   :  { %2128 = vmatprep.subr.bf16.mxu0 %v2301_v1 }
 0x3e6   :  { %2130 = vmatpush3.bf16.msra.mxu0 %v2460_v48  ;;  %v1057_v48 = vadd.f32 %v1056_v39, %v1055_v0 }
 0x3e7   :  { %2131 = vmatprep.subr.bf16.mxu0 %v2301_v1 }
 0x3ea   :  { %2133 = vmatpush3.bf16.msra.mxu0 %v2495_v47 }
 0x3eb   :  { %2134 = vmatprep.subr.bf16.mxu0 %v2301_v1 }
 0x3ee   :  { %2136 = vmatpush3.bf16.msra.mxu0 %v2501_v63 }
 0x3ef   :  { %2137 = vmatprep.subr.bf16.mxu0 %v2301_v1 }
 0x3f2   :  { %2139 = vmatpush3.bf16.msra.mxu0 %v2507_v4 }
 0x3f3   :  { %2140 = vmatprep.subr.bf16.mxu0 %v2301_v1 }
 0x3f6   :  { %2142 = vmatpush3.bf16.msra.mxu0 %v2513_v7 }
 0x3f7   :  { %2143 = vmatprep.subr.bf16.mxu0 %v2301_v1 }
 0x3fa   :  { %2145 = vmatpush3.bf16.msra.mxu0 %v2518_v10 }
 0x3fd   :  { %1856 = vmatmul.mubr.f32.vlgmr.msra.gmra.mrb[6].mxu0 %v1057_v48 }
 0x4b0   :  { %v1140_v47 = vpop.f32.mrb[4].mxu0 }
 0x4b1   :  { %v1144_v44 = vmul.f32 0.001953125, %v1140_v47  ;;  %v1822_v63 = vpop.f32.mrb[5].mxu0 }
 0x4b3   :  { %v1222_v46 = vrot.slane %v1144_v44, %v2569_v26  ;;  %v1216_v5 = vmul.f32 %v1144_v44, %v1144_v44 }
 0x4b5   :  { %v1223_v53 = vsub.f32 %v1013_v13, %v1222_v46  ;;  %v1224_v4 = vsub.f32 %v2622_v42, %v1222_v46  ;;  %v1225_v62 = vsub.f32 %v1023_v9, %v1222_v46  ;;  %v1226_v2 = vsub.f32 %v1787_v49, %v1222_v46 }
 0x4d0   :  { %v1211_v3 = vpop.f32.mrb[6].mxu0 }
 0x4d1   :  { %v1215_v7 = vmul.f32 0.001953125, %v1211_v3  ;;  %v1857_v14 = vpop.f32.mrb[7].mxu0 }
 0x4d3   :  { %v1217_v1 = vsub.f32 %v1215_v7, %v1216_v5 }
 0x4d5   :  { %v1218_v16 = vmax.f32 %v1217_v1, 0.0 }
 0x4d7   :  { %v1227_v20 = vadd.f32 1e-05, %v1218_v16 }
 0x4d9   :  { %2174 = vrsqrt.f32 %v1227_v20 }
 0x4e3   :  { %v2175_v10 = vpop.eup %2174 }
 0x4e4   :  { %v1232_v28 = vrot.slane %v2175_v10, %v2569_v26 }
 0x4e6   :  { %v1233_v30 = vmul.f32 %v1232_v28, %v1223_v53  ;;  %v1234_v31 = vmul.f32 %v1232_v28, %v1224_v4  ;;  %v1235_v32 = vmul.f32 %v1232_v28, %v1225_v62  ;;  %v1236_v6 = vmul.f32 %v1232_v28, %v1226_v2 }
 0x4e8   :  { %v1244_v25 = vmul.f32 %v1300_v29, %v1233_v30  ;;  %v1245_v33 = vmul.f32 %v1300_v29, %v1234_v31  ;;  %v1246_v34 = vmul.f32 %v1300_v29, %v1235_v32  ;;  %v1247_v35 = vmul.f32 %v1300_v29, %v1236_v6 }
 0x4ea   :  { %v1255_v27 = vadd.f32 %v1301_v8, %v1244_v25  ;;  %v1256_v37 = vadd.f32 %v1301_v8, %v1245_v33  ;;  %v1257_v21 = vadd.f32 %v1301_v8, %v1246_v34  ;;  %v1258_v26 = vadd.f32 %v1301_v8, %v1247_v35 }
 0x4ec   :  { %v1259_v38 = vadd.f32 %v1255_v27, %v2428_v11  ;;  %v1260_v40 = vadd.f32 %v1256_v37, %v2430_v12  ;;  %v1261_v22 = vadd.f32 %v1257_v21, %v2434_v18  ;;  %v1262_v42 = vadd.f32 %v1258_v26, %v2436_v19 }
 0x4ee   :  { %vm1263_vm7 = vcmp.gt.f32.partialorder %v1259_v38, 0.0  ;;  %vm1264_vm8 = vcmp.gt.f32.partialorder %v1260_v40, 0.0  ;;  %vm1265_vm9 = vcmp.gt.f32.partialorder %v1261_v22, 0.0  ;;  %vm1266_vm10 = vcmp.gt.f32.partialorder %v1262_v42, 0.0 }
 0x4ef   :  { %v1267_v15 = vmul.f32 0.01, %v1259_v38  ;;  %v1268_v13 = vmul.f32 0.01, %v1260_v40  ;;  %v1269_v45 = vmul.f32 0.01, %v1261_v22 }
 0x4f0   :  { %v1270_v24 = vmul.f32 0.01, %v1262_v42 }
 0x4f1   :  { %v1271_v17 = vsel %vm1263_vm7, %v1259_v38, %v1267_v15  ;;  %v1272_v49 = vsel %vm1264_vm8, %v1260_v40, %v1268_v13  ;;  %v1273_v9 = vsel %vm1265_vm9, %v1261_v22, %v1269_v45 }
 0x4f2   :  { %v1274_v11 = vsel %vm1266_vm10, %v1262_v42, %v1270_v24  ;;  %1275 = vst [vmem:[#allocation11] sm:$0xff] %v1271_v17  ;;  %1276 = vst [vmem:[#allocation11 + $0x8] sm:$0xff] %v1272_v49 }
 0x4f3   :  { %1277 = vst [vmem:[#allocation11 + $0x10] sm:$0xff] %v1273_v9  ;;  %1278 = vst [vmem:[#allocation11 + $0x18] sm:$0xff] %v1274_v11 }
 0x4f4   :  { %2275 = shalt.err (!%p2272_p8)
}
 0x4f5   :  { %s2276_s20 = scalar_lea.hbm %s2680_s8, 512 }
 0x4f6   :  { %p2277_p9 = scmp.ne.s32.totalorder %s2680_s8, %s2276_s20  ;;  %p2280_p10 = scmp.lt.u32.totalorder %s2276_s20, %s2680_s8 }
 0x4f8   :  { %p2282_p11 = pnand %p2280_p10, %p2277_p9 }
 0x4fa   :  { %2285 = shalt.err (!%p2282_p11)
}
 0x4fb   :  { %1290 = dma.vmem_to_hbm [thread:$0]  %s1285_s7, 512, %s2680_s8, [#allocation5], %s2296_s17, %s2296_s17, %s2297_s18  }
 0x4fc   :  { %2292 = dma.done.wait [#allocation5], 512  }
 0x4fd   :  { %2293 = vsyncadd [#allocation5], 4294966784 }
 0x4fe   :  { %1294 = vsyncpa [#allocation4], 1 }
 0x4ff   :  { %1295 = vsyncpa [#allocation7], 1 }
 0x500   :  { %1296 = vsyncpa [#allocation10], 1 }
 0x501   :  { %1297 = vsyncpa [#allocation5], 1 }

</bundles_post_ra>
